<compile_context>
chip_gen: v5e
topology: v5e:2x2
jax: 0.10.0
libtpu: 0.0.40
codegen_flags: <defaults>
</compile_context>

<pallas_src>
import functools

import jax
import jax.numpy as jnp
import numpy as np
from jax import lax
from jax.experimental import pallas as pl
from jax.experimental.pallas import tpu as pltpu

NEG_SLOPE = 0.01  # nn.LeakyReLU() default


def _leaky(v):
    return jnp.where(v >= 0, v, NEG_SLOPE * v)


def genblock_kernel(x_ref, xh_ref, wsc_ref, bsc_ref, w1_ref, b1_ref,
                    w2k_ref, b2_ref, w3_ref, b3_ref, out_ref,
                    *, th, w, mm_dtype):
    # x_ref:   (1, Ci, TH*W)    channel-first row tile, lanes = spatial (lane-dense)
    # xh_ref:  (1, 1, Ci, 2*W)  row above (cols :W) / below (cols W:) the tile
    # wsc:(Co,Ci) w1:(Cb,Ci) w2k:(3,Cb,3*Cb) w3:(Co,Cb)   (pre-cast to mm_dtype)
    # biases: (C, 1) f32.       out_ref: (1, Co, TH*W)
    cb = w1_ref.shape[0]
    tw = th * w
    lh = (th + 2) * w
    lhp = lh + (-lh) % 128          # lane-pad so the rolled buffer is 128-aligned

    i = pl.program_id(1)
    last = pl.num_programs(1) - 1

    xv = x_ref[0]                   # (Ci, TH*W), already mm_dtype
    w1 = w1_ref[...]

    # ---- conv1 (1x1) + LeakyReLU (f32 accumulate / activation) ----
    h = _leaky(jnp.dot(w1, xv, preferred_element_type=jnp.float32) + b1_ref[...])

    # ---- conv1 recomputed on the two halo rows (2 rows of a tiny matmul) ----
    xh = xh_ref[0, 0]               # (Ci, 2*W), mm_dtype
    hh = _leaky(jnp.dot(w1, xh, preferred_element_type=jnp.float32) + b1_ref[...])
    # conv2 zero-pads its *input* (h), so at the image top/bottom the halo must be 0.
    h_top = jnp.where(i == 0, 0.0, hh[:, :w])      # (Cb, W)
    h_bot = jnp.where(i == last, 0.0, hh[:, w:])   # (Cb, W)

    # ---- conv2 (3x3, stride 1, pad 1) in the flat lane-dense layout ----
    pieces = [h_top, h, h_bot]
    if lhp > lh:
        pieces.append(jnp.zeros((cb, lhp - lh), jnp.float32))
    h_full = jnp.concatenate(pieces, axis=1)       # (Cb, lhp), f32

    # kw = -1 / +1 taps: lane roll (XLU) + column mask.  The mask both implements
    # the zero column padding and kills values that wrap across a row boundary /
    # buffer end in the flat layout.
    col = lax.broadcasted_iota(jnp.int32, (cb, lhp), 1) % w
    h_m1 = jnp.where(col == 0, 0.0, pltpu.roll(h_full, 1, axis=1))        # in[.., c-1]
    h_p1 = jnp.where(col == w - 1, 0.0, pltpu.roll(h_full, lhp - 1, axis=1))  # in[.., c+1]

    # Stack the three kw taps on the channel axis; every kh tap is then a pure
    # lane-offset slice of `hs`, feeding one K=3*Cb matmul (3 matmuls, f32 acc).
    # (On v7x the 9-way per-tap accumulation is equally good; 3 larger-K matmuls
    #  amortize the MXU result FIFO better on v5e/v6e.)
    hs = jnp.concatenate([h_m1.astype(mm_dtype), h_full.astype(mm_dtype),
                          h_p1.astype(mm_dtype)], axis=0)                 # (3*Cb, lhp)
    acc = jnp.dot(w2k_ref[0], hs[:, 0:tw], preferred_element_type=jnp.float32)
    acc = acc + jnp.dot(w2k_ref[1], hs[:, w:w + tw],
                        preferred_element_type=jnp.float32)
    acc = acc + jnp.dot(w2k_ref[2], hs[:, 2 * w:2 * w + tw],
                        preferred_element_type=jnp.float32)
    h2 = _leaky(acc + b2_ref[...])                                        # (Cb, TH*W)

    # ---- conv3 (1x1), no activation before the residual add ----
    y = jnp.dot(w3_ref[...], h2.astype(mm_dtype),
                preferred_element_type=jnp.float32) + b3_ref[...]

    # ---- shortcut (1x1 + LeakyReLU), computed late to keep its live range short ----
    t = _leaky(jnp.dot(wsc_ref[...], xv, preferred_element_type=jnp.float32)
               + bsc_ref[...])

    out_ref[0] = _leaky(y + t).astype(out_ref.dtype)


def _build_halo(x_nchw, th):
    """(N, Ci, H, W) -> (N, H//th, Ci, 2*W): row above / below each row tile (zeros at edges)."""
    n, ci, h, w = x_nchw.shape
    nt = h // th
    zrow = jnp.zeros((n, ci, 1, w), x_nchw.dtype)
    if nt > 1:
        top = jnp.concatenate([zrow, x_nchw[:, :, th - 1:h - 1:th, :]], axis=2)  # (N,Ci,nt,W)
        bot = jnp.concatenate([x_nchw[:, :, th::th, :], zrow], axis=2)           # (N,Ci,nt,W)
    else:
        top, bot = zrow, zrow
    halo = jnp.concatenate([top, bot], axis=3)                                   # (N,Ci,nt,2W)
    return jnp.transpose(halo, (0, 2, 1, 3))                                     # (N,nt,Ci,2W)


def _tile_vmem_bytes(ci, cb, co, th, w, in_item, mm_item, out_item):
    """Rough per-grid-step VMEM footprint (double-buffered tiles + resident weights
    + live intermediates). Used only to pick the tile / scoped-VMEM limit."""
    tw = th * w
    lh = (th + 2) * w
    lhp = lh + (-lh) % 128
    weights = (co * ci + cb * ci + 9 * cb * cb + co * cb) * mm_item + (2 * co + 2 * cb) * 4
    tiles = 2 * (ci * tw + ci * 2 * w) * in_item + 2 * co * tw * out_item
    live = (cb * tw * 4                # h (f32)
            + 3 * cb * lhp * 4         # h_full / h_m1 / h_p1 (f32)
            + cb * lhp * 4             # column-index mask
            + 3 * cb * lhp * mm_item   # stacked kw taps
            + cb * tw * 4              # conv2 accumulator
            + cb * tw * mm_item        # h2 cast for conv3
            + 2 * co * tw * 4)         # y, t
    return weights + tiles + live


def _choose_row_tile(n, h, w, ci, cb, co, in_item, mm_item, out_item,
                     row_tile=None, target_lanes=4096,
                     vmem_budget=24 * 1024 * 1024):
    """Pick TH: largest divisor of H that fits a v7x-safe VMEM budget, keeps the
    grid >= 2 steps (both v7x TensorCores busy), prefers (TH*W)%128==0 lane-dense
    blocks, and targets a few thousand lanes to amortize per-step overhead."""
    if row_tile is not None:
        if h % row_tile != 0:
            raise ValueError(f"row_tile={row_tile} must divide H={h}")
        return row_tile
    divisors = [d for d in range(1, h + 1) if h % d == 0]
    cands = [d for d in divisors
             if _tile_vmem_bytes(ci, cb, co, d, w, in_item, mm_item, out_item)
             <= vmem_budget] or [1]
    multi = [d for d in cands if n * (h // d) >= 2]
    if multi:
        cands = multi
    aligned = [d for d in cands if (d * w) % 128 == 0]
    if aligned:
        cands = aligned
    small = [d for d in cands if d * w <= target_lanes]
    return max(small if small else cands)


def genblock_forward(x_nchw, params, *, row_tile=None,
                     matmul_dtype=jnp.float32, out_dtype=jnp.float32):
    """GenBlock(ci, cb, co, resample=0, shortcut=True). Input/output NCHW.

    matmul_dtype=jnp.bfloat16 is recommended on v5e/v6e/v7x (the MXU is bf16
    native on all three); elementwise math and accumulation stay f32, but the
    self-test tolerance would need loosening.  out_dtype=bfloat16 halves the
    output writeback when the consumer tolerates it.
    """
    wsc, bsc, w1, b1, w2, b2, w3, b3 = params
    n, ci, h, w = x_nchw.shape
    cb = w1.shape[0]
    co = w3.shape[0]

    in_item = jnp.dtype(matmul_dtype).itemsize
    out_item = jnp.dtype(out_dtype).itemsize
    th = _choose_row_tile(n, h, w, ci, cb, co, in_item, in_item, out_item,
                          row_tile=row_tile)
    nt = h // th
    tw = th * w

    # Channel-first, lanes = spatial (free reshape); pre-cast matmul operands so no
    # invariant per-grid-step casts and halved x DMA on the bf16 path.
    x_flat = x_nchw.reshape(n, ci, h * w).astype(matmul_dtype)
    x_halo = _build_halo(x_nchw, th).astype(matmul_dtype)

    # 3x3 weight OIHW -> (KH, Cout, 3*Cin): one weight slab per kh for the K=3*Cb
    # matmuls; K-dim order is kw-major / cin-minor, matching the [c-1 | c | c+1] stack.
    w2k = jnp.transpose(w2, (2, 0, 3, 1)).reshape(3, cb, 3 * cb).astype(matmul_dtype)
    wsc_c = wsc.astype(matmul_dtype)
    w1_c = w1.astype(matmul_dtype)
    w3_c = w3.astype(matmul_dtype)
    bsc_c = bsc.reshape(co, 1).astype(jnp.float32)
    b1_c = b1.reshape(cb, 1).astype(jnp.float32)
    b2_c = b2.reshape(cb, 1).astype(jnp.float32)
    b3_c = b3.reshape(co, 1).astype(jnp.float32)

    est = _tile_vmem_bytes(ci, cb, co, th, w, in_item, in_item, out_item)
    # Scoped-VMEM limit derived from the tile; kept under v7x's 64 MiB physical VMEM.
    vmem_limit = int(min(max(2 * est, 32 * 1024 * 1024), 56 * 1024 * 1024))

    vmem = pl.BlockSpec(memory_space=pltpu.MemorySpace.VMEM)
    kernel = functools.partial(genblock_kernel, th=th, w=w, mm_dtype=matmul_dtype)

    # TODO(synk): for real model configs with large channel counts, additionally pad
    # Ci/Cb/Co toward multiples of 8 (and aim for matmul K >= 128) for better MXU
    # fill; unnecessary at these sizes where the kernel is overhead/DMA bound.
    out_flat = pl.pallas_call(
        kernel,
        out_shape=jax.ShapeDtypeStruct((n, co, h * w), out_dtype),
        grid=(n, nt),
        in_specs=[
            pl.BlockSpec((1, ci, tw), lambda b, i: (b, 0, i)),           # x row tile
            pl.BlockSpec((1, 1, ci, 2 * w), lambda b, i: (b, i, 0, 0)),  # halo rows
            vmem, vmem, vmem, vmem, vmem, vmem, vmem, vmem,              # weights/biases
        ],
        out_specs=pl.BlockSpec((1, co, tw), lambda b, i: (b, 0, i)),
        compiler_params=pltpu.CompilerParams(
            dimension_semantics=("parallel", "parallel"),
            vmem_limit_bytes=vmem_limit),
    )(x_flat, x_halo, wsc_c, bsc_c, w1_c, b1_c, w2k, b2_c, w3_c, b3_c)

    return out_flat.reshape(n, co, h, w)


def make_params(key, ci, cb, co):
    """PyTorch-layout parameters: 1x1 convs as (Cout, Cin), 3x3 conv as OIHW."""
    ks = jax.random.split(key, 8)
    s = 0.1
    wsc = jax.random.normal(ks[0], (co, ci), jnp.float32) * s
    bsc = jax.random.normal(ks[1], (co,), jnp.float32) * s
    w1 = jax.random.normal(ks[2], (cb, ci), jnp.float32) * s
    b1 = jax.random.normal(ks[3], (cb,), jnp.float32) * s
    w2 = jax.random.normal(ks[4], (cb, cb, 3, 3), jnp.float32) * s
    b2 = jax.random.normal(ks[5], (cb,), jnp.float32) * s
    w3 = jax.random.normal(ks[6], (co, cb), jnp.float32) * s
    b3 = jax.random.normal(ks[7], (co,), jnp.float32) * s
    return (wsc, bsc, w1, b1, w2, b2, w3, b3)


def ref_forward(x_nchw, params):
    """Pure-JAX reference (XLA convs) with identical semantics, for verification."""
    wsc, bsc, w1, b1, w2, b2, w3, b3 = params
    x = jnp.transpose(x_nchw, (0, 2, 3, 1))  # NHWC

    def conv(hh, w_hwio, b, pad):
        o = lax.conv_general_dilated(hh, w_hwio, (1, 1), pad,
                                     dimension_numbers=('NHWC', 'HWIO', 'NHWC'))
        return o + b.reshape(1, 1, 1, -1)

    def hwio_1x1(wmat):  # (Cout, Cin) -> (1, 1, Cin, Cout)
        return wmat.T.reshape(1, 1, wmat.shape[1], wmat.shape[0])

    t = _leaky(conv(x, hwio_1x1(wsc), bsc, 'VALID'))
    h = _leaky(conv(x, hwio_1x1(w1), b1, 'VALID'))
    h = _leaky(conv(h, jnp.transpose(w2, (2, 3, 1, 0)), b2, 'SAME'))
    y = conv(h, hwio_1x1(w3), b3, 'VALID')
    y = _leaky(y + t)
    return jnp.transpose(y, (0, 3, 1, 2))


if __name__ == "__main__":
    key = jax.random.PRNGKey(0)
    kx, kp = jax.random.split(key)

    # GenBlock(ci=4, cb=8, co=4, resample=0, shortcut=True)
    N, Ci, Cb, Co, H, W = 2, 4, 8, 4, 16, 16
    x = jax.random.normal(kx, (N, Ci, H, W), jnp.float32)
    params = make_params(kp, Ci, Cb, Co)

    ref = jax.block_until_ready(ref_forward(x, params))

    # Auto-chosen tile (here TH=H -> grid (N, 1); still >= 2 steps for both v7x TCs).
    out = jax.block_until_ready(genblock_forward(x, params))
    np.testing.assert_allclose(np.asarray(out), np.asarray(ref), rtol=1e-4, atol=1e-4)

    # Forced multi-row-tile path to exercise the inter-tile halo handling.
    out2 = jax.block_until_ready(genblock_forward(x, params, row_tile=8))
    np.testing.assert_allclose(np.asarray(out2), np.asarray(ref), rtol=1e-4, atol=1e-4)

    print("KERNEL_OK")
</pallas_src>

<mosaic_0001>
module attributes {stable_mosaic.version = 11 : i64} {
  func.func @genblock_kernel(%arg0: i32, %arg1: i32, %arg2: memref<1x4x256xf32, #tpu.memory_space<vmem>>, %arg3: memref<1x1x4x32xf32, #tpu.memory_space<vmem>>, %arg4: memref<4x4xf32, #tpu.memory_space<vmem>>, %arg5: memref<4x1xf32, #tpu.memory_space<vmem>>, %arg6: memref<8x4xf32, #tpu.memory_space<vmem>>, %arg7: memref<8x1xf32, #tpu.memory_space<vmem>>, %arg8: memref<3x8x24xf32, #tpu.memory_space<vmem>>, %arg9: memref<8x1xf32, #tpu.memory_space<vmem>>, %arg10: memref<4x8xf32, #tpu.memory_space<vmem>>, %arg11: memref<4x1xf32, #tpu.memory_space<vmem>>, %arg12: memref<1x4x256xf32, #tpu.memory_space<vmem>>) attributes {dimension_semantics = [#tpu.dimension_semantics<parallel>, #tpu.dimension_semantics<parallel>], iteration_bounds = array<i64: 2, 1>, scalar_prefetch = 0 : i64, scratch_operands = 0 : i64, tpu.core_type = #tpu.core_type<tc>, window_params = [{transform_indices = @transform_0, window_bounds = array<i64: 1, 4, 256>}, {transform_indices = @transform_1, window_bounds = array<i64: 1, 1, 4, 32>}, {pipeline_mode = #tpu.pipeline_mode<synchronous>, transform_indices = @transform_2, window_bounds = array<i64: 4, 4>}, {pipeline_mode = #tpu.pipeline_mode<synchronous>, transform_indices = @transform_3, window_bounds = array<i64: 4, 1>}, {pipeline_mode = #tpu.pipeline_mode<synchronous>, transform_indices = @transform_4, window_bounds = array<i64: 8, 4>}, {pipeline_mode = #tpu.pipeline_mode<synchronous>, transform_indices = @transform_5, window_bounds = array<i64: 8, 1>}, {pipeline_mode = #tpu.pipeline_mode<synchronous>, transform_indices = @transform_6, window_bounds = array<i64: 3, 8, 24>}, {pipeline_mode = #tpu.pipeline_mode<synchronous>, transform_indices = @transform_7, window_bounds = array<i64: 8, 1>}, {pipeline_mode = #tpu.pipeline_mode<synchronous>, transform_indices = @transform_8, window_bounds = array<i64: 4, 8>}, {pipeline_mode = #tpu.pipeline_mode<synchronous>, transform_indices = @transform_9, window_bounds = array<i64: 4, 1>}, {transform_indices = @transform_10, window_bounds = array<i64: 1, 4, 256>}]} {
    %c0 = arith.constant 0 : index
    %c0_0 = arith.constant 0 : index
    %c0_1 = arith.constant 0 : index
    %0 = vector.load %arg2[%c0, %c0_0, %c0_1] : memref<1x4x256xf32, #tpu.memory_space<vmem>>, vector<1x4x256xf32>
    %1 = vector.shape_cast %0 : vector<1x4x256xf32> to vector<4x256xf32>
    %c0_2 = arith.constant 0 : index
    %c0_3 = arith.constant 0 : index
    %2 = vector.load %arg6[%c0_2, %c0_3] : memref<8x4xf32, #tpu.memory_space<vmem>>, vector<8x4xf32>
    %cst = arith.constant dense<0.000000e+00> : vector<8x256xf32>
    %3 = tpu.matmul %2, %1, %cst {dimension_numbers = #tpu.dot_dimension_numbers<[1], [0], [0], [1], [0, 0, 1, 1], [], []>} : vector<8x4xf32>, vector<4x256xf32>, vector<8x256xf32> -> vector<8x256xf32>
    %c0_4 = arith.constant 0 : index
    %c0_5 = arith.constant 0 : index
    %4 = vector.load %arg7[%c0_4, %c0_5] : memref<8x1xf32, #tpu.memory_space<vmem>>, vector<8x1xf32>
    %5 = vector.broadcast %4 : vector<8x1xf32> to vector<8x256xf32>
    %6 = arith.addf %3, %5 : vector<8x256xf32>
    %cst_6 = arith.constant 0.000000e+00 : f32
    %7 = vector.broadcast %cst_6 : f32 to vector<8x256xf32>
    %8 = arith.cmpf oge, %6, %7 : vector<8x256xf32>
    %cst_7 = arith.constant 0.00999999977 : f32
    %9 = vector.broadcast %cst_7 : f32 to vector<8x256xf32>
    %10 = arith.mulf %9, %6 : vector<8x256xf32>
    %11 = arith.select %8, %6, %10 : vector<8x256xi1>, vector<8x256xf32>
    %c0_8 = arith.constant 0 : index
    %c0_9 = arith.constant 0 : index
    %c0_10 = arith.constant 0 : index
    %c0_11 = arith.constant 0 : index
    %12 = vector.load %arg3[%c0_8, %c0_9, %c0_10, %c0_11] : memref<1x1x4x32xf32, #tpu.memory_space<vmem>>, vector<1x1x4x32xf32>
    %13 = vector.shape_cast %12 : vector<1x1x4x32xf32> to vector<4x32xf32>
    %cst_12 = arith.constant dense<0.000000e+00> : vector<8x32xf32>
    %14 = tpu.matmul %2, %13, %cst_12 {dimension_numbers = #tpu.dot_dimension_numbers<[1], [0], [0], [1], [0, 0, 1, 1], [], []>} : vector<8x4xf32>, vector<4x32xf32>, vector<8x32xf32> -> vector<8x32xf32>
    %c0_13 = arith.constant 0 : index
    %c0_14 = arith.constant 0 : index
    %15 = vector.load %arg7[%c0_13, %c0_14] : memref<8x1xf32, #tpu.memory_space<vmem>>, vector<8x1xf32>
    %16 = vector.broadcast %15 : vector<8x1xf32> to vector<8x32xf32>
    %17 = arith.addf %14, %16 : vector<8x32xf32>
    %cst_15 = arith.constant 0.000000e+00 : f32
    %18 = vector.broadcast %cst_15 : f32 to vector<8x32xf32>
    %19 = arith.cmpf oge, %17, %18 : vector<8x32xf32>
    %cst_16 = arith.constant 0.00999999977 : f32
    %20 = vector.broadcast %cst_16 : f32 to vector<8x32xf32>
    %21 = arith.mulf %20, %17 : vector<8x32xf32>
    %22 = arith.select %19, %17, %21 : vector<8x32xi1>, vector<8x32xf32>
    %c0_i32 = arith.constant 0 : i32
    %23 = arith.cmpi eq, %arg1, %c0_i32 : i32
    %24 = vector.extract_strided_slice %22 {offsets = [0, 0], sizes = [8, 16], strides = [1, 1]} : vector<8x32xf32> to vector<8x16xf32>
    %cst_17 = arith.constant 0.000000e+00 : f32
    %25 = vector.broadcast %cst_17 : f32 to vector<8x16xf32>
    %26 = arith.select %23, %25, %24 : vector<8x16xf32>
    %c0_i32_18 = arith.constant 0 : i32
    %27 = arith.cmpi eq, %arg1, %c0_i32_18 : i32
    %28 = vector.extract_strided_slice %22 {offsets = [0, 16], sizes = [8, 16], strides = [1, 1]} : vector<8x32xf32> to vector<8x16xf32>
    %cst_19 = arith.constant 0.000000e+00 : f32
    %29 = vector.broadcast %cst_19 : f32 to vector<8x16xf32>
    %30 = arith.select %27, %29, %28 : vector<8x16xf32>
    %cst_20 = arith.constant 0.000000e+00 : f32
    %31 = vector.broadcast %cst_20 : f32 to vector<8x96xf32>
    %32 = tpu.concatenate %26, %11, %30, %31 in 1 : vector<8x16xf32>, vector<8x256xf32>, vector<8x16xf32>, vector<8x96xf32> -> vector<8x384xf32>
    %33 = tpu.iota {dimensions = array<i32: 1>} : vector<8x384xi32>
    %c16_i32 = arith.constant 16 : i32
    %c0_i32_21 = arith.constant 0 : i32
    %34 = arith.cmpi eq, %c16_i32, %c0_i32_21 : i32
    %c1_i32 = arith.constant 1 : i32
    %35 = arith.select %34, %c1_i32, %c16_i32 : i32
    %36 = vector.broadcast %35 : i32 to vector<8x384xi32>
    %37 = arith.remsi %33, %36 : vector<8x384xi32>
    %c0_i32_22 = arith.constant 0 : i32
    %38 = vector.broadcast %c0_i32_22 : i32 to vector<8x384xi32>
    %39 = arith.cmpi ne, %37, %38 : vector<8x384xi32>
    %c0_i32_23 = arith.constant 0 : i32
    %40 = vector.broadcast %c0_i32_23 : i32 to vector<8x384xi32>
    %41 = arith.cmpi slt, %37, %40 : vector<8x384xi32>
    %c0_i32_24 = arith.constant 0 : i32
    %42 = arith.cmpi slt, %35, %c0_i32_24 : i32
    %43 = vector.broadcast %42 : i1 to vector<8x384xi1>
    %44 = vector.broadcast %43 : vector<8x384xi1> to vector<8x384xi1>
    %45 = arith.xori %41, %44 : vector<8x384xi1>
    %46 = arith.andi %45, %39 : vector<8x384xi1>
    %47 = vector.broadcast %35 : i32 to vector<8x384xi32>
    %48 = arith.addi %37, %47 : vector<8x384xi32>
    %49 = arith.select %46, %48, %37 : vector<8x384xi1>, vector<8x384xi32>
    %c0_i32_25 = arith.constant 0 : i32
    %50 = vector.broadcast %c0_i32_25 : i32 to vector<8x384xi32>
    %51 = arith.cmpi eq, %49, %50 : vector<8x384xi32>
    %c1_i32_26 = arith.constant 1 : i32
    %52 = tpu.dynamic_rotate %32 by %c1_i32_26 dim 1 : vector<8x384xf32>, i32 -> vector<8x384xf32>
    %cst_27 = arith.constant 0.000000e+00 : f32
    %53 = vector.broadcast %cst_27 : f32 to vector<8x384xf32>
    %54 = arith.select %51, %53, %52 : vector<8x384xi1>, vector<8x384xf32>
    %c15_i32 = arith.constant 15 : i32
    %55 = vector.broadcast %c15_i32 : i32 to vector<8x384xi32>
    %56 = arith.cmpi eq, %49, %55 : vector<8x384xi32>
    %c383_i32 = arith.constant 383 : i32
    %57 = tpu.dynamic_rotate %32 by %c383_i32 dim 1 : vector<8x384xf32>, i32 -> vector<8x384xf32>
    %cst_28 = arith.constant 0.000000e+00 : f32
    %58 = vector.broadcast %cst_28 : f32 to vector<8x384xf32>
    %59 = arith.select %56, %58, %57 : vector<8x384xi1>, vector<8x384xf32>
    %60 = tpu.concatenate %54, %32, %59 in 0 : vector<8x384xf32>, vector<8x384xf32>, vector<8x384xf32> -> vector<24x384xf32>
    %c0_29 = arith.constant 0 : index
    %c0_30 = arith.constant 0 : index
    %c0_31 = arith.constant 0 : index
    %61 = vector.load %arg8[%c0_29, %c0_30, %c0_31] : memref<3x8x24xf32, #tpu.memory_space<vmem>>, vector<1x8x24xf32>
    %62 = vector.shape_cast %61 : vector<1x8x24xf32> to vector<8x24xf32>
    %63 = vector.extract_strided_slice %60 {offsets = [0, 0], sizes = [24, 256], strides = [1, 1]} : vector<24x384xf32> to vector<24x256xf32>
    %cst_32 = arith.constant dense<0.000000e+00> : vector<8x256xf32>
    %64 = tpu.matmul %62, %63, %cst_32 {dimension_numbers = #tpu.dot_dimension_numbers<[1], [0], [0], [1], [0, 0, 1, 1], [], []>} : vector<8x24xf32>, vector<24x256xf32>, vector<8x256xf32> -> vector<8x256xf32>
    %c1 = arith.constant 1 : index
    %c0_33 = arith.constant 0 : index
    %c0_34 = arith.constant 0 : index
    %65 = vector.load %arg8[%c1, %c0_33, %c0_34] : memref<3x8x24xf32, #tpu.memory_space<vmem>>, vector<1x8x24xf32>
    %66 = vector.shape_cast %65 : vector<1x8x24xf32> to vector<8x24xf32>
    %67 = vector.extract_strided_slice %60 {offsets = [0, 16], sizes = [24, 256], strides = [1, 1]} : vector<24x384xf32> to vector<24x256xf32>
    %cst_35 = arith.constant dense<0.000000e+00> : vector<8x256xf32>
    %68 = tpu.matmul %66, %67, %cst_35 {dimension_numbers = #tpu.dot_dimension_numbers<[1], [0], [0], [1], [0, 0, 1, 1], [], []>} : vector<8x24xf32>, vector<24x256xf32>, vector<8x256xf32> -> vector<8x256xf32>
    %69 = arith.addf %64, %68 : vector<8x256xf32>
    %c2 = arith.constant 2 : index
    %c0_36 = arith.constant 0 : index
    %c0_37 = arith.constant 0 : index
    %70 = vector.load %arg8[%c2, %c0_36, %c0_37] : memref<3x8x24xf32, #tpu.memory_space<vmem>>, vector<1x8x24xf32>
    %71 = vector.shape_cast %70 : vector<1x8x24xf32> to vector<8x24xf32>
    %72 = vector.extract_strided_slice %60 {offsets = [0, 32], sizes = [24, 256], strides = [1, 1]} : vector<24x384xf32> to vector<24x256xf32>
    %cst_38 = arith.constant dense<0.000000e+00> : vector<8x256xf32>
    %73 = tpu.matmul %71, %72, %cst_38 {dimension_numbers = #tpu.dot_dimension_numbers<[1], [0], [0], [1], [0, 0, 1, 1], [], []>} : vector<8x24xf32>, vector<24x256xf32>, vector<8x256xf32> -> vector<8x256xf32>
    %74 = arith.addf %69, %73 : vector<8x256xf32>
    %c0_39 = arith.constant 0 : index
    %c0_40 = arith.constant 0 : index
    %75 = vector.load %arg9[%c0_39, %c0_40] : memref<8x1xf32, #tpu.memory_space<vmem>>, vector<8x1xf32>
    %76 = vector.broadcast %75 : vector<8x1xf32> to vector<8x256xf32>
    %77 = arith.addf %74, %76 : vector<8x256xf32>
    %cst_41 = arith.constant 0.000000e+00 : f32
    %78 = vector.broadcast %cst_41 : f32 to vector<8x256xf32>
    %79 = arith.cmpf oge, %77, %78 : vector<8x256xf32>
    %cst_42 = arith.constant 0.00999999977 : f32
    %80 = vector.broadcast %cst_42 : f32 to vector<8x256xf32>
    %81 = arith.mulf %80, %77 : vector<8x256xf32>
    %82 = arith.select %79, %77, %81 : vector<8x256xi1>, vector<8x256xf32>
    %c0_43 = arith.constant 0 : index
    %c0_44 = arith.constant 0 : index
    %83 = vector.load %arg10[%c0_43, %c0_44] : memref<4x8xf32, #tpu.memory_space<vmem>>, vector<4x8xf32>
    %cst_45 = arith.constant dense<0.000000e+00> : vector<4x256xf32>
    %84 = tpu.matmul %83, %82, %cst_45 {dimension_numbers = #tpu.dot_dimension_numbers<[1], [0], [0], [1], [0, 0, 1, 1], [], []>} : vector<4x8xf32>, vector<8x256xf32>, vector<4x256xf32> -> vector<4x256xf32>
    %c0_46 = arith.constant 0 : index
    %c0_47 = arith.constant 0 : index
    %85 = vector.load %arg11[%c0_46, %c0_47] : memref<4x1xf32, #tpu.memory_space<vmem>>, vector<4x1xf32>
    %86 = vector.broadcast %85 : vector<4x1xf32> to vector<4x256xf32>
    %87 = arith.addf %84, %86 : vector<4x256xf32>
    %c0_48 = arith.constant 0 : index
    %c0_49 = arith.constant 0 : index
    %88 = vector.load %arg4[%c0_48, %c0_49] : memref<4x4xf32, #tpu.memory_space<vmem>>, vector<4x4xf32>
    %cst_50 = arith.constant dense<0.000000e+00> : vector<4x256xf32>
    %89 = tpu.matmul %88, %1, %cst_50 {dimension_numbers = #tpu.dot_dimension_numbers<[1], [0], [0], [1], [0, 0, 1, 1], [], []>} : vector<4x4xf32>, vector<4x256xf32>, vector<4x256xf32> -> vector<4x256xf32>
    %c0_51 = arith.constant 0 : index
    %c0_52 = arith.constant 0 : index
    %90 = vector.load %arg5[%c0_51, %c0_52] : memref<4x1xf32, #tpu.memory_space<vmem>>, vector<4x1xf32>
    %91 = vector.broadcast %90 : vector<4x1xf32> to vector<4x256xf32>
    %92 = arith.addf %89, %91 : vector<4x256xf32>
    %cst_53 = arith.constant 0.000000e+00 : f32
    %93 = vector.broadcast %cst_53 : f32 to vector<4x256xf32>
    %94 = arith.cmpf oge, %92, %93 : vector<4x256xf32>
    %cst_54 = arith.constant 0.00999999977 : f32
    %95 = vector.broadcast %cst_54 : f32 to vector<4x256xf32>
    %96 = arith.mulf %95, %92 : vector<4x256xf32>
    %97 = arith.select %94, %92, %96 : vector<4x256xi1>, vector<4x256xf32>
    %98 = arith.addf %87, %97 : vector<4x256xf32>
    %cst_55 = arith.constant 0.000000e+00 : f32
    %99 = vector.broadcast %cst_55 : f32 to vector<4x256xf32>
    %100 = arith.cmpf oge, %98, %99 : vector<4x256xf32>
    %cst_56 = arith.constant 0.00999999977 : f32
    %101 = vector.broadcast %cst_56 : f32 to vector<4x256xf32>
    %102 = arith.mulf %101, %98 : vector<4x256xf32>
    %103 = arith.select %100, %98, %102 : vector<4x256xi1>, vector<4x256xf32>
    %c0_57 = arith.constant 0 : index
    %c0_58 = arith.constant 0 : index
    %c0_59 = arith.constant 0 : index
    %104 = vector.load %arg12[%c0_57, %c0_58, %c0_59] : memref<1x4x256xf32, #tpu.memory_space<vmem>>, vector<1x4x256xf32>
    %105 = vector.shape_cast %104 : vector<1x4x256xf32> to vector<4x256xf32>
    %106 = vector.shape_cast %103 : vector<4x256xf32> to vector<1x4x256xf32>
    tpu.vector_store %arg12[%c0_57, %c0_58, %c0_59], %106 {strides = array<i32>} : memref<1x4x256xf32, #tpu.memory_space<vmem>>, vector<1x4x256xf32>,
    return
  }
  func.func @transform_0(%arg0: i32, %arg1: i32) -> (i32, i32, i32) {
    %c0_i32 = arith.constant 0 : i32
    %c0_i32_0 = arith.constant 0 : i32
    return %arg0, %c0_i32, %arg1 : i32, i32, i32
  }
  func.func @transform_1(%arg0: i32, %arg1: i32) -> (i32, i32, i32, i32) {
    %c0_i32 = arith.constant 0 : i32
    %c0_i32_0 = arith.constant 0 : i32
    %c0_i32_1 = arith.constant 0 : i32
    return %arg0, %arg1, %c0_i32, %c0_i32_0 : i32, i32, i32, i32
  }
  func.func @transform_2(%arg0: i32, %arg1: i32) -> (i32, i32) {
    %c0_i32 = arith.constant 0 : i32
    %c0_i32_0 = arith.constant 0 : i32
    %c0_i32_1 = arith.constant 0 : i32
    return %c0_i32, %c0_i32_0 : i32, i32
  }
  func.func @transform_3(%arg0: i32, %arg1: i32) -> (i32, i32) {
    %c0_i32 = arith.constant 0 : i32
    %c0_i32_0 = arith.constant 0 : i32
    %c0_i32_1 = arith.constant 0 : i32
    return %c0_i32, %c0_i32_0 : i32, i32
  }
  func.func @transform_4(%arg0: i32, %arg1: i32) -> (i32, i32) {
    %c0_i32 = arith.constant 0 : i32
    %c0_i32_0 = arith.constant 0 : i32
    %c0_i32_1 = arith.constant 0 : i32
    return %c0_i32, %c0_i32_0 : i32, i32
  }
  func.func @transform_5(%arg0: i32, %arg1: i32) -> (i32, i32) {
    %c0_i32 = arith.constant 0 : i32
    %c0_i32_0 = arith.constant 0 : i32
    %c0_i32_1 = arith.constant 0 : i32
    return %c0_i32, %c0_i32_0 : i32, i32
  }
  func.func @transform_6(%arg0: i32, %arg1: i32) -> (i32, i32, i32) {
    %c0_i32 = arith.constant 0 : i32
    %c0_i32_0 = arith.constant 0 : i32
    %c0_i32_1 = arith.constant 0 : i32
    %c0_i32_2 = arith.constant 0 : i32
    return %c0_i32, %c0_i32_0, %c0_i32_1 : i32, i32, i32
  }
  func.func @transform_7(%arg0: i32, %arg1: i32) -> (i32, i32) {
    %c0_i32 = arith.constant 0 : i32
    %c0_i32_0 = arith.constant 0 : i32
    %c0_i32_1 = arith.constant 0 : i32
    return %c0_i32, %c0_i32_0 : i32, i32
  }
  func.func @transform_8(%arg0: i32, %arg1: i32) -> (i32, i32) {
    %c0_i32 = arith.constant 0 : i32
    %c0_i32_0 = arith.constant 0 : i32
    %c0_i32_1 = arith.constant 0 : i32
    return %c0_i32, %c0_i32_0 : i32, i32
  }
  func.func @transform_9(%arg0: i32, %arg1: i32) -> (i32, i32) {
    %c0_i32 = arith.constant 0 : i32
    %c0_i32_0 = arith.constant 0 : i32
    %c0_i32_1 = arith.constant 0 : i32
    return %c0_i32, %c0_i32_0 : i32, i32
  }
  func.func @transform_10(%arg0: i32, %arg1: i32) -> (i32, i32, i32) {
    %c0_i32 = arith.constant 0 : i32
    %c0_i32_0 = arith.constant 0 : i32
    return %arg0, %c0_i32, %arg1 : i32, i32, i32
  }
}

</mosaic_0001>

<bundles_post_ra>
// kernel: tpu_custom_call.1
= control target key start
LH: loop header
LB: loop body
LE: loop exit
PB: predicated region body
PF: predicated region fallthrough
CT: control target
= control target key end

     0   :  { %s1633_s0 = inlined_call_operand.vmem [shape: f32[2,4,256], index: 0, kind: input, shape index: {}]   ;;  %s1634_s1 = inlined_call_operand.vmem [shape: f32[2,1,4,32], index: 1, kind: input, shape index: {}]   ;;  %s1635_s2 = inlined_call_operand.vmem [shape: f32[4,4], index: 2, kind: input, shape index: {}]   ;;  %s1636_s3 = inlined_call_operand.vmem [shape: f32[4,1], index: 3, kind: input, shape index: {}]   ;;  %s1637_s4 = inlined_call_operand.vmem [shape: f32[8,4], index: 4, kind: input, shape index: {}]   ;;  %s1638_s5 = inlined_call_operand.vmem [shape: f32[8,1], index: 5, kind: input, shape index: {}]   ;;  %s1639_s6 = inlined_call_operand.hbm [shape: f32[3,8,24], index: 6, kind: input, shape index: {}]   ;;  %s1640_s7 = inlined_call_operand.vmem [shape: f32[8,1], index: 7, kind: input, shape index: {}]   ;;  %s1641_s8 = inlined_call_operand.vmem [shape: f32[4,8], index: 8, kind: input, shape index: {}]   ;;  %s1642_s9 = inlined_call_operand.vmem [shape: f32[4,1], index: 9, kind: input, shape index: {}]   ;;  %s1643_s10 = inlined_call_operand.hbm [shape: f32[2,4,256], index: 10, kind: output, shape index: {}]  }
   0x1   :  { %1644 = sst [smem:[#allocation8_spill]] %s1633_s0 }
   0x2   :  { %15 = vsyncpa [#allocation3], 0 }
   0x3   :  { %16 = vsyncpa [#allocation4], 0 }
   0x4   :  { %18 = vsyncpa [#allocation4 + $0x1], 0  ;;  %s1432_s13 = smov 0   ;;  %s1434_s14 = smov 0  }
   0x5   :  { %s1436_s15 = smov 0   ;;  %s1438_s16 = smov 0  }
   0x6   :  { %s1440_s17 = smov 0   ;;  %s1442_s18 = smov 0  }
   0x7 LB: > { %s1091_s19 = sadd.s32 4294967295, %s1366_s18   ;;  %s1092_s20 = sadd.s32 4294967294, %s1366_s18   ;;  %s1366_s18 = sphi %s1442_s18, %s24_s18   ;;  %s1362_s17 = sphi %s1440_s17, %s1658_s17   ;;  %s1358_s16 = sphi %s1438_s16, %s1657_s16   ;;  %s1354_s15 = sphi %s1436_s15, %s1656_s15   ;;  %s1350_s14 = sphi %s1434_s14, %s1655_s14   ;;  %s1346_s13 = sphi %s1432_s13, %s1654_s13  }
   0x8   : > { %s36_s21 = sadd.s32 1, %s1362_s17  ;;  %s269_s22 = sadd.s32 1, %s1354_s15 }
   0x9   : > { %p38_p0 = scmp.ge.s32.totalorder %s36_s21, 2  ;;  %p279_p1 = scmp.ne.s32.totalorder %s1354_s15, %s1350_s14 }
   0xa   : > { %p280_p2 = scmp.eq.s32.totalorder %s1091_s19, 1  ;;  %p285_p3 = scmp.ne.s32.totalorder %s1350_s14, %s1346_s13 }
   0xb   : > { %s1660_s21 = smov (%p38_p0, %s36_s21), 0  ;;  %p286_p5 = scmp.eq.s32.totalorder %s1092_s20, 1 }
   0xc   : > { %p1472_p4 = por %p280_p2, %p279_p1  ;;  %s264_s24 = ssub.s32 %s1362_s17, %s1660_s21 }
   0xd   : > { %p1093_p6 = scmp.ge.s32.totalorder %s1366_s18, 1  ;;  %p267_p7 = scmp.eq.s32.totalorder %s264_s24, 0 }
   0xe   : > { %p1479_p8 = por %p286_p5, %p285_p3  ;;  %p293_p9 = scmp.lt.s32.totalorder %s1366_s18, 3 }
   0xf   : > { %s1485_s26 = scalar_select %p267_p7, %s1354_s15, %s269_s22  }
  0x10   : > { %p294_p10 = pnand %p1093_p6, %p293_p9  ;;  %p1151_p11 = scmp.eq.s32.totalorder %s1091_s19, 0 }
  0x11   : > { %s316_s29 = sshll.u32 %s1639_s6, 4  ;;  %s1368_s30 = smov [#allocation2]   ;;  %s317_s29 = int_to_ptr.hbm [resolvable:$true] %s316_s29 }
  0x12   : > { %p1143_p12 = pneg %p294_p10  ;;  %s318_s11 = sshll.u32 %s1368_s30, 4  ;;  %s319_s11 = int_to_ptr.vmem [resolvable:$true] %s318_s11 }
  0x13   : > { %s1369_s12 = smov 128   ;;  %s1370_s20 = smov 8  }
  0x14   : > { %p1144_p13 = pnand %p1151_p11, %p1143_p12  ;;  %366 = sbr.rel (%p294_p10) target bundleno = 828 (0x33c), region = 60 }
  0x16   : > { %1146 = dma.hbm_to_vmem [thread:$0]  (!%p1144_p13), %s317_s29, 384, %s319_s11, [#allocation3], %s1369_s12, %s1369_s12, %s1370_s20  }
  0x19   : > { %1337 = dma.done.wait (%p1151_p11), [#allocation3], 384  }
  0x1a   : > { %1339 = vsyncadd (%p1151_p11), [#allocation3], 4294966912  ;;  %p417_p0 = scmp.lt.s32.totalorder %s1358_s16, 1  ;;  %v1371_v0 = vmov 0   ;;  %s1647_s0 = sld [smem:[#allocation8_spill]]  ;;  %v436_v2 = vld [vmem:[%s1638_s5] sm:$0xff]  ;;  %v548_v23 = vlaneseq }
  0x1b   : > { %1211 = vset.pattern.permute.xlu0 %v1371_v0  ;;  %1252 = vset.pattern.permute.xlu1 %v1371_v0  ;;  %vm450_vm0 = vcmask 1043456   ;;  %v435_v3 = vld [vmem:[%s1637_s4] sm:$0xff]  ;;  %vm446_vm1 = vcmask 31744   ;;  %s1372_s20 = smov 16   ;;  %vm539_vm4 = vcmask 130048   ;;  %s1374_s24 = smov 127  }
  0x1c   : > { %s1492_s19 = scalar_select %p417_p0, %s1358_s16, 1  ;;  %1253 = vset.pattern.permute.xlu2 %v1371_v0  ;;  %439 = vperm.xlu0 %1211, %v436_v2   ;;  %vm546_vm5 = vcmask 261120   ;;  %v549_v24 = vand.u32 127, %v548_v23  ;;  %vm1112_vm14 = vmneg %vm539_vm4  ;;  %v842_v54 = vld [vmem:[%s1642_s9] sm:$0xf]  ;;  %v620_v56 = vld [vmem:[#allocation2] sm:$0xff] }
  0x1d   : > { %s1375_s27 = smov 112   ;;  %v827_v2 = vld [vmem:[%s1640_s7] sm:$0xff]  ;;  %s413_s12 = sand.u32 1, %s1350_s14  }
  0x1e   : > { %s1135_s22 = sshll.u32 %s1492_s19, 3  ;;  %v550_v25 = vadd.s32 128, %v549_v24  ;;  %vm613_vm7 = vcmp.lt.s32.totalorder %v549_v24, 127  ;;  %v551_v31 = vadd.s32 256, %v549_v24  ;;  %v556_v32 = vand.u32 15, %v549_v24 }
  0x1f   : > { %vm597_vm10 = vcmp.lt.s32.totalorder %v549_v24, 1 }
  0x20   : > { %s424_s28 = scalar_lea.vmem %s1647_s0, %s1135_s22  ;;  %s1373_s22 = smov 1   ;;  %v563_v27 = vand.u32 15, %v550_v25  ;;  %v570_v33 = vand.u32 15, %v551_v31  ;;  %vm1529_vm9 = vcmp.eq.s32.totalorder %v556_v32, 15  ;;  %vm1535_vm13 = vcmp.eq.s32.totalorder %v556_v32, 0 }
  0x21   : > { %v434_v1 = vld [vmem:[%s424_s28] sm:$0xff]  ;;  %s1101_s28 = sshll.u32 %s1492_s19, 2  ;;  %vm1110_vm12 = vmneg %vm1529_vm9  ;;  %s1376_s19 = smov 96  }
  0x22   : > { %443 = vst [vmem:[#allocation1] ss:$2 sm:$0xff] %v434_v1  ;;  %s432_s11 = scalar_lea.vmem %s1634_s1, %s1101_s28  ;;  %vm1522_vm6 = vcmp.eq.s32.totalorder %v563_v27, 15  ;;  %vm606_vm11 = vcmp.eq.s32.totalorder %v570_v33, 15  ;;  %vm1114_vm15 = vmneg %vm1535_vm13 }
  0x23   : > { %v501_v22 = vld [vmem:[%s432_s11] sm:$0xf]  ;;  %vm1117_vm8 = vmneg %vm1522_vm6 }
  0x24   : > { %1106 = vmatpush.msk.msra.mxu2 %vm450_vm0, %v501_v22 }
  0x25   : > { %1107 = vmatmul.msk.f32.vlgmr.msra.gmra.mxu2 %vm446_vm1, %v435_v3 }
  0x29   : > { %v444_v4 = vld.sshfl [vmem:[#allocation1] sm:$0xff pattern:$0x75316420]  ;;  %v445_v5 = vld.sshfl [vmem:[#allocation1 + $0x8] sm:$0xff pattern:$0x75316420] }
  0x2a   : > { %1102 = vmatpush.msk.msra.mxu0 %vm450_vm0, %v444_v4  ;;  %1104 = vmatpush.msk.msra.mxu1 %vm450_vm0, %v445_v5  ;;  %899 = vst [vmem:[#allocation1] ss:$2 sm:$0xff] %v434_v1 }
  0x2b   : > { %1103 = vmatmul.msk.f32.vlgmr.msra.gmra.mxu0 %vm446_vm1, %v435_v3  ;;  %1105 = vmatmul.msk.f32.vlgmr.msra.gmra.mxu1 %vm446_vm1, %v435_v3 }
  0x31   : > { %v900_v34 = vld.sshfl [vmem:[#allocation1] sm:$0xff pattern:$0x75316420]  ;;  %v901_v36 = vld.sshfl [vmem:[#allocation1 + $0x8] sm:$0xff pattern:$0x75316420] }
  0x8e   : > { %v440_v6 = vpop.permute.xlu0 %439 }
  0xa8   : > { %v472_v7 = vpop.f32.mrf.mxu0  ;;  %v492_v8 = vpop.f32.mrf.mxu1 }
  0xa9   : > { %v473_v9 = vadd.f32 %v472_v7, %v440_v6  ;;  %v493_v10 = vadd.f32 %v492_v8, %v440_v6  ;;  %v522_v55 = vpop.f32.mrf.mxu2 }
  0xab   : > { %v498_v11 = vmul.f32 0.01, %v493_v10  ;;  %vm496_vm2 = vcmp.ge.f32.partialorder %v493_v10, 0.0  ;;  %vm495_vm3 = vcmp.ge.f32.partialorder %v473_v9, 0.0  ;;  %v497_v12 = vmul.f32 0.01, %v473_v9 }
  0xad   : > { %v500_v13 = vsel %vm496_vm2, %v493_v10, %v498_v11  ;;  %v499_v14 = vsel %vm495_vm3, %v473_v9, %v497_v12  ;;  %vm589_vm2 = vcmp.eq.s32.totalorder %v563_v27, 0  ;;  %vm590_vm3 = vcmp.eq.s32.totalorder %v570_v33, 0 }
  0xae   : > { %537 = vrot.lane.b32.xlu0 %v500_v13, %s1372_s20  ;;  %535 = vrot.lane.b32.xlu1 %v499_v14, %s1372_s20  ;;  %s1098_s20 = sshll.u32 %s413_s12, 3 }
  0xaf   : > { %s415_s29 = scalar_lea.vmem [#allocation5], %s1098_s20 }
  0xb0   : > { %s985_s30 = sshll.u32 %s415_s29, 4  ;;  %s986_s30 = int_to_ptr.vmem [resolvable:$true] %s985_s30 }
 0x120   : > { %v538_v15 = vpop.permute.xlu0 %537  ;;  %v536_v16 = vpop.permute.xlu1 %535 }
 0x121   : > { %v540_v17 = vsel %vm539_vm4, %v536_v16, %v538_v15  ;;  %v1510_v18 = vsel %vm539_vm4, 0.0, %v536_v16  ;;  %v545_v19 = vsel %vm539_vm4, %v538_v15, 0.0  ;;  %vm1119_vm4 = vmneg %vm589_vm2 }
 0x122   : > { %591 = vrot.lane.b32.xlu0 %v1510_v18, %s1373_s22  ;;  %607 = vrot.lane.b32.xlu1 %v1510_v18, %s1374_s24  ;;  %v547_v20 = vsel %vm546_vm5, %v545_v19, 0.0  ;;  %vm662_vm5 = vcmask 195584  }
 0x123   : > { %609 = vrot.lane.b32.xlu2 %v540_v17, %s1374_s24  ;;  %v1212_v21 = vpack.i.bf16 %v547_v20, %v540_v17 }
 0x12a   : > { %593 = vrot.lane.b32.xlu1 %v540_v17, %s1373_s22 }
 0x12b   : > { %611 = vrot.lane.b32.xlu2 %v547_v20, %s1374_s24 }
 0x132   : > { %1213 = vrot.lane.b32.xlu1 %v1212_v21, %s1375_s27 }
 0x133   : > { %595 = vrot.lane.b32.xlu2 %v547_v20, %s1373_s22  ;;  %s1136_s22 = sshll.u32 %s1358_s16, 3  ;;  %s970_s16 = scalar_lea.sflag [#allocation4], %s413_s12 }
 0x134   : > { %s983_s28 = scalar_lea.hbm %s1643_s10, %s1136_s22 }
 0x135   : > { %s987_s11 = sshll.u32 %s983_s28, 4  ;;  %s988_s11 = int_to_ptr.hbm [resolvable:$true] %s987_s11 }
 0x17d   : > { %v610_v26 = vpop.permute.xlu2 %609 }
 0x185   : > { %v612_v29 = vpop.permute.xlu2 %611 }
 0x186   : > { %v614_v30 = vsel %vm613_vm7, %v610_v26, %v612_v29 }
 0x187   : > { %1118 = vmatpush.msk.msrb.mxu2 %vm1117_vm8, %v614_v30  ;;  %v618_v42 = vsel %vm1522_vm6, 0.0, %v614_v30  ;;  %vm649_vm6 = vcmask 916480   ;;  %v750_v30 = vld [vmem:[#allocation2 + $0x10] sm:$0xff] }
 0x189   : > { %743 = vmatpush.msrb.mxu2 %v540_v17  ;;  %v622_v17 = vld [vmem:[#allocation2 + $0x8] sm:$0xff] }
 0x18d   : > { %v596_v35 = vpop.permute.xlu2 %595 }
 0x194   : > { %v592_v37 = vpop.permute.xlu0 %591  ;;  %v608_v38 = vpop.permute.xlu1 %607 }
 0x195   : > { %v600_v39 = vsel %vm597_vm10, %v596_v35, %v592_v37  ;;  %v616_v40 = vsel %vm613_vm7, %v612_v29, %v608_v38  ;;  %v615_v41 = vsel %vm613_vm7, %v608_v38, %v610_v26  ;;  %vm769_vm7 = vcmask 785408  }
 0x196   : > { %v619_v43 = vsel %vm606_vm11, 0.0, %v616_v40  ;;  %1111 = vmatpush.msk.msrb.mxu1 %vm1110_vm12, %v615_v41  ;;  %v601_v44 = vsel %vm1535_vm13, 0.0, %v600_v39  ;;  %v617_v49 = vsel %vm1529_vm9, 0.0, %v615_v41 }
 0x197   : > { %v1222_v45 = vpack.i.bf16 %v619_v43, %v618_v42  ;;  %631 = vrot.lane.b32.xlu1 %v601_v44, %s1375_s27 }
 0x198   : > { %1113 = vmatpush.msk.msrb.mxu1 %vm1112_vm14, %v536_v16 }
 0x199   : > { %1223 = vrot.lane.b32.xlu0 %v1222_v45, %s1375_s27 }
 0x19a   : > { %1115 = vmatpush.msk.msrb.mxu1 %vm1114_vm15, %v600_v39 }
 0x19b   : > { %1116 = vmatmul.msk.f32.vlgmr.msrb.gmra.mxu1 %vm662_vm5, %v620_v56 }
 0x19c   : > { %v594_v46 = vpop.permute.xlu1 %593 }
 0x19d   : > { %v598_v47 = vsel %vm597_vm10, %v594_v46, %v596_v35  ;;  %v599_v48 = vsel %vm597_vm10, %v592_v37, %v594_v46  ;;  %v892_v35 = vld [vmem:[%s1635_s2] sm:$0xf] }
 0x19e   : > { %v603_v50 = vsel %vm590_vm3, 0.0, %v598_v47  ;;  %v602_v51 = vsel %vm589_vm2, 0.0, %v599_v48  ;;  %1120 = vmatpush.msk.msrb.mxu2 %vm1119_vm4, %v599_v48  ;;  %v893_v37 = vld [vmem:[%s1636_s3] sm:$0xf] }
 0x19f   : > { %v1227_v52 = vpack.i.bf16 %v1510_v18, %v603_v50  ;;  %v1237_v53 = vpack.i.bf16 %v602_v51, %v617_v49  ;;  %1121 = vmatmul.msk.f32.vlgmr.msrb.gmra.mxu2 %vm662_vm5, %v620_v56  ;;  %v841_v48 = vld [vmem:[%s1641_s8] sm:$0xf] }
 0x1a1   : > { %1218 = vrot.lane.b32.xlu2 %v1237_v53, %s1375_s27  ;;  %1238 = vrot.lane.b32.xlu1 %v1237_v53, %s1376_s19 }
 0x1a2   : > { %1228 = vrot.lane.b32.xlu0 %v1227_v52, %s1375_s27  ;;  %s1304_s27 = scalar_lea.hbm %s1643_s10, 16 }
 0x1a4   : > { %v1214_v57 = vpop.permute.xlu1 %1213 }
 0x1a5   : > { %v1216_v59 = vunpack.i.h.bf16 %v1214_v57  ;;  %v1215_v62 = vunpack.i.l.bf16 %v1214_v57 }
 0x1a7   : > { %v653_v6 = vsel %vm649_vm6, %v1215_v62, %v1216_v59 }
 0x1a9   : > { %1243 = vrot.lane.b32.xlu2 %v1222_v45, %s1376_s19  ;;  %830 = vperm.xlu1 %1252, %v827_v2  }
 0x1aa   : > { %1233 = vrot.lane.b32.xlu0 %v1212_v21, %s1376_s19 }
 0x1b1   : > { %1248 = vrot.lane.b32.xlu2 %v1227_v52, %s1376_s19 }
 0x1b2   : > { %751 = vrot.lane.b32.xlu0 %v601_v44, %s1376_s19  ;;  %s1298_s19 = sshra.s32 %s988_s11, 4  ;;  %s1299_s19 = int_to_ptr.hbm [resolvable:$true] %s1298_s19 }
 0x1b3   : > { %s1300_s22 = scalar_lea.hbm %s1299_s19, 8  ;;  %p1305_p5 = scmp.lt.s32.totalorder %s1299_s19, %s1643_s10 }
 0x1b4   : > { %p1301_p1 = scmp.ne.s32.totalorder %s1299_s19, %s1300_s22  ;;  %p1306_p6 = scmp.lt.s32.totalorder %s1304_s27, %s1300_s22 }
 0x1b6   : > { %p1302_p2 = pnand %p1301_p1, %p1472_p4  ;;  %p1307_p7 = por %p1306_p6, %p1305_p5 }
 0x1b8   : > { %p1303_p3 = pneg %p1302_p2 }
 0x1b9   : > { %896 = vperm.xlu2 %1253, %v893_v37  }
 0x1ba   : > { %845 = vperm.xlu0 %1211, %v842_v54   ;;  %p1308_p9 = pnand %p1307_p7, %p1303_p3 }
 0x1fb   : > { %v1219_v58 = vpop.permute.xlu2 %1218 }
 0x1fc   : > { %v1220_v63 = vunpack.i.l.bf16 %v1219_v58  ;;  %v1221_v11 = vunpack.i.h.bf16 %v1219_v58 }
 0x203   : > { %v1244_v5 = vpop.permute.xlu2 %1243 }
 0x204   : > { %v1246_v8 = vunpack.i.h.bf16 %v1244_v5  ;;  %v1245_v9 = vunpack.i.l.bf16 %v1244_v5 }
 0x206   : > { %v775_v18 = vsel %vm769_vm7, %v1245_v9, %v1246_v8 }
 0x209   : > { %v632_v60 = vpop.permute.xlu1 %631 }
 0x20a   : > { %v650_v19 = vsel %vm649_vm6, %v632_v60, %v1221_v11 }
 0x20b   : > { %v1224_v61 = vpop.permute.xlu0 %1223  ;;  %v1249_v20 = vpop.permute.xlu2 %1248 }
 0x20c   : > { %v1226_v0 = vunpack.i.h.bf16 %v1224_v61  ;;  %v1225_v1 = vunpack.i.l.bf16 %v1224_v61  ;;  %v1251_v23 = vunpack.i.h.bf16 %v1249_v20  ;;  %v1250_v27 = vunpack.i.l.bf16 %v1249_v20 }
 0x20e   : > { %v654_v3 = vsel %vm649_vm6, %v1220_v63, %v1225_v1  ;;  %v655_v4 = vsel %vm649_vm6, %v1225_v1, %v1226_v0 }
 0x20f   : > { %679 = vmatpush.msra.mxu3 %v654_v3  ;;  %699 = vmatpush.msrb.mxu0 %v655_v4 }
 0x211   : > { %700 = vmatpush.msrb.mxu0 %v653_v6 }
 0x213   : > { %v1239_v7 = vpop.permute.xlu1 %1238  ;;  %v897_v56 = vpop.permute.xlu2 %896 }
 0x214   : > { %v1229_v10 = vpop.permute.xlu0 %1228  ;;  %v1240_v14 = vunpack.i.l.bf16 %v1239_v7  ;;  %v1241_v24 = vunpack.i.h.bf16 %v1239_v7 }
 0x215   : > { %v1231_v12 = vunpack.i.h.bf16 %v1229_v10  ;;  %v1230_v13 = vunpack.i.l.bf16 %v1229_v10 }
 0x216   : > { %v774_v21 = vsel %vm769_vm7, %v1240_v14, %v1245_v9  ;;  %v771_v31 = vsel %vm769_vm7, %v1241_v24, %v1250_v27 }
 0x217   : > { %v652_v15 = vsel %vm649_vm6, %v1231_v12, %v1215_v62  ;;  %v651_v16 = vsel %vm649_vm6, %v1221_v11, %v1230_v13 }
 0x218   : > { %680 = vmatpush.msra.mxu3 %v652_v15  ;;  %701 = vmatpush.msrb.mxu0 %v651_v16  ;;  %v726_v47 = vpop.f32.mrf.mxu1 }
 0x219   : > { %1109 = vmatmul.msk.f32.vlgmr.msrb.gmra.mxu0 %vm662_vm5, %v622_v17 }
 0x21a   : > { %818 = vmatpush.msra.mxu0 %v775_v18  ;;  %681 = vmatpush.msra.mxu3 %v650_v19 }
 0x21b   : > { %1108 = vmatmul.msk.f32.vlgmr.msra.gmra.mxu3 %vm662_vm5, %v622_v17  ;;  %v831_v41 = vpop.permute.xlu1 %830 }
 0x21c   : > { %798 = vmatpush.msrb.mxu3 %v774_v21  ;;  %v1234_v22 = vpop.permute.xlu0 %1233 }
 0x21d   : > { %v1236_v25 = vunpack.i.h.bf16 %v1234_v22  ;;  %v1235_v26 = vunpack.i.l.bf16 %v1234_v22 }
 0x21f   : > { %v772_v28 = vsel %vm769_vm7, %v1251_v23, %v1235_v26  ;;  %v773_v29 = vsel %vm769_vm7, %v1235_v26, %v1236_v25 }
 0x220   : > { %799 = vmatpush.msrb.mxu3 %v772_v28  ;;  %819 = vmatpush.msra.mxu0 %v773_v29 }
 0x222   : > { %820 = vmatpush.msra.mxu0 %v771_v31  ;;  %v746_v39 = vpop.f32.mrf.mxu2 }
 0x223   : > { %1123 = vmatmul.msk.f32.vlgmr.msra.gmra.mxu0 %vm662_vm5, %v750_v30 }
 0x224   : > { %v752_v32 = vpop.permute.xlu0 %751  ;;  %1128 = vmatpush.msk.msrb.mxu0 %vm450_vm0, %v901_v36 }
 0x225   : > { %v770_v33 = vsel %vm769_vm7, %v752_v32, %v1241_v24 }
 0x226   : > { %800 = vmatpush.msrb.mxu3 %v770_v33 }
 0x227   : > { %1122 = vmatmul.msk.f32.vlgmr.msrb.gmra.mxu3 %vm662_vm5, %v750_v30 }
 0x228   : > { %1126 = vmatpush.msk.msra.mxu3 %vm450_vm0, %v900_v34 }
 0x22b   : > { %1129 = vmatmul.msk.f32.vlgmr.msrb.gmra.mxu0 %vm446_vm1, %v892_v35 }
 0x22c   : > { %v846_v62 = vpop.permute.xlu0 %845 }
 0x22f   : > { %1127 = vmatmul.msk.f32.vlgmr.msra.gmra.mxu3 %vm446_vm1, %v892_v35  ;;  %vm848_vm1 = vcmask 64512  }
 0x296   : > { %v703_v38 = vpop.f32.mrf.mxu0 }
 0x297   : > { %v747_v40 = vadd.f32 %v746_v39, %v703_v38 }
 0x29e   : > { %v683_v43 = vpop.f32.mrf.mxu3 }
 0x29f   : > { %v727_v50 = vadd.f32 %v726_v47, %v683_v43 }
 0x2a0   : > { %v822_v42 = vpop.f32.mrf.mxu0 }
 0x2a1   : > { %v826_v44 = vadd.f32 %v822_v42, %v747_v40 }
 0x2a3   : > { %v834_v45 = vadd.f32 %v831_v41, %v826_v44 }
 0x2a5   : > { %vm836_vm8 = vcmp.ge.f32.partialorder %v834_v45, 0.0  ;;  %v838_v46 = vmul.f32 0.01, %v834_v45 }
 0x2a7   : > { %v840_v49 = vsel %vm836_vm8, %v834_v45, %v838_v46 }
 0x2a8   : > { %887 = vmatpush.msra.mxu2 %v840_v49  ;;  %v946_v57 = vpop.f32.mrf.mxu0 }
 0x2a9   : > { %1125 = vmatmul.msk.f32.vlgmr.msra.gmra.mxu2 %vm848_vm1, %v841_v48  ;;  %v947_v58 = vadd.f32 %v946_v57, %v897_v56 }
 0x2aa   : > { %v802_v51 = vpop.f32.mrf.mxu3 }
 0x2ab   : > { %v825_v52 = vadd.f32 %v802_v51, %v727_v50  ;;  %v952_v60 = vmul.f32 0.01, %v947_v58  ;;  %vm950_vm10 = vcmp.ge.f32.partialorder %v947_v58, 0.0 }
 0x2ad   : > { %v833_v53 = vadd.f32 %v831_v41, %v825_v52  ;;  %v954_v0 = vsel %vm950_vm10, %v947_v58, %v952_v60 }
 0x2af   : > { %v837_v54 = vmul.f32 0.01, %v833_v53  ;;  %vm835_vm9 = vcmp.ge.f32.partialorder %v833_v53, 0.0 }
 0x2b1   : > { %v839_v55 = vsel %vm835_vm9, %v833_v53, %v837_v54 }
 0x2b2   : > { %867 = vmatpush.msra.mxu1 %v839_v55  ;;  %v926_v59 = vpop.f32.mrf.mxu3 }
 0x2b3   : > { %1124 = vmatmul.msk.f32.vlgmr.msra.gmra.mxu1 %vm848_vm1, %v841_v48  ;;  %v927_v61 = vadd.f32 %v926_v59, %v897_v56 }
 0x2b5   : > { %v951_v2 = vmul.f32 0.01, %v927_v61  ;;  %vm949_vm11 = vcmp.ge.f32.partialorder %v927_v61, 0.0 }
 0x2b7   : > { %v953_v7 = vsel %vm949_vm11, %v927_v61, %v951_v2 }
 0x32c   : > { %v889_v63 = vpop.f32.mrf.mxu2 }
 0x32d   : > { %v890_v1 = vadd.f32 %v889_v63, %v846_v62 }
 0x32f   : > { %v956_v3 = vadd.f32 %v954_v0, %v890_v1 }
 0x330   : > { %v869_v4 = vpop.f32.mrf.mxu1 }
 0x331   : > { %vm958_vm12 = vcmp.ge.f32.partialorder %v956_v3, 0.0  ;;  %v960_v5 = vmul.f32 0.01, %v956_v3  ;;  %v870_v6 = vadd.f32 %v869_v4, %v846_v62 }
 0x333   : > { %v962_v8 = vsel %vm958_vm12, %v956_v3, %v960_v5  ;;  %v955_v9 = vadd.f32 %v953_v7, %v870_v6 }
 0x334   : > { %v965_v11 = vrot.slane %v962_v8, 4 }
 0x335   : > { %vm957_vm13 = vcmp.ge.f32.partialorder %v955_v9, 0.0  ;;  %v959_v10 = vmul.f32 0.01, %v955_v9 }
 0x337   : > { %v961_v12 = vsel %vm957_vm13, %v955_v9, %v959_v10 }
 0x338   : > { %v966_v13 = vsel %vm450_vm0, %v961_v12, %v965_v11 }
 0x339   : > { %968 = vst [vmem:[%s415_s29] sm:$0xff] %v966_v13 }
 0x33a   : > { %1311 = shalt.err (!%p1308_p9)
}
 0x33b   : > { %1141 = dma.vmem_to_hbm [thread:$0]  (%p1472_p4), %s986_s30, 128, %s988_s11, %s970_s16  }
 0x33c PF: > { %p1153_p10 = scmp.ge.s32.totalorder %s1366_s18, 2  ;;  %s999_s12 = sand.u32 1, %s1346_s13  }
 0x33d   : > { %s1000_s29 = scalar_lea.sflag [#allocation4], %s999_s12 }
 0x33e   : > { %p1148_p11 = pnand %p1153_p10, %p1479_p8 }
 0x340   : > { %p1149_p12 = pneg %p1148_p11 }
 0x342   : > { %1341 = dma.done.wait (%p1149_p12), %s1000_s29, 128  }
 0x343   : > { %1343 = vsyncadd (%p1149_p12), %s1000_s29, 4294967168  ;;  %s24_s18 = sadd.s32 1, %s1366_s18   ;;  %s1654_s13 = smov %s1350_s14 }
 0x344   : > { %p21_p13 = scmp.ge.s32.totalorder %s24_s18, 4   ;;  %s1655_s14 = smov %s1354_s15 }
 0x345   : > { %s1656_s15 = smov %s1485_s26  ;;  %s1657_s16 = smov %s1362_s17 }
 0x346   : > { %s1658_s17 = smov %s1660_s21  ;;  %23 = sbr.rel (!%p21_p13) target bundleno = 7 (0x7), region = 105 }
 0x34b   :  { %1006 = vsyncpa [#allocation3], 1 }
 0x34c   :  { %1008 = vsyncpa [#allocation3 + $0x1], 1 }
 0x34d   :  { %1009 = vsyncpa [#allocation4], 1 }
 0x34e   :  { %1011 = vsyncpa [#allocation4 + $0x1], 1 }

</bundles_post_ra>
